<compile_context>
chip_gen: v7x
topology: tpu7x:2x2x1
jax: 0.10.0
libtpu: 0.0.40
codegen_flags: <defaults>
</compile_context>

<pallas_src>
import jax
import jax.numpy as jnp
from jax import lax
from jax.experimental import pallas as pl
from jax.experimental.pallas import tpu as pltpu


def _round_up(v, m):
    return ((v + m - 1) // m) * m


def _pick_tile(n_pad, cap):
    # n_pad is a multiple of 128; return the largest power-of-two tile <= cap dividing it.
    t = min(cap, n_pad)
    while n_pad % t != 0:
        t //= 2
    return t


def gat_prep_kernel(x_ref, wt_ref, att_src_ref, att_dst_ref,
                    h_ref, asrc_ref, adst_ref):
    """Pass 1: h = x @ W^T (bf16 out), a_src row [1, TP], a_dst column [TP, 1]."""
    h = jnp.dot(x_ref[...], wt_ref[...], preferred_element_type=jnp.float32)   # [TP, Cp]
    h_bf = h.astype(jnp.bfloat16)
    h_ref[...] = h_bf
    # Source-side attention term as a lane-oriented [1, TP] row via an MXU contraction
    # (contract Cp of att_src against Cp of h) -- avoids VPU mul + XLU reduce + transpose.
    asrc_ref[...] = lax.dot_general(att_src_ref[...], h_bf,
                                    dimension_numbers=(((1,), (1,)), ((), ())),
                                    preferred_element_type=jnp.float32)        # [1, TP]
    # Destination-side term stays a column (consumed per destination-row tile).
    adst_ref[...] = jnp.sum(h * att_dst_ref[...].astype(jnp.float32),
                            axis=-1, keepdims=True)                            # [TP, 1]


def gat_flash_kernel(adst_ref, asrc_ref, h_ref, bias_ref, adj_ref,
                     o_ref, m_sc, l_sc, acc_sc):
    """Pass 2: online-softmax aggregation over source tiles + bias + L2 normalize."""
    s = pl.program_id(1)

    @pl.when(s == 0)
    def _init():
        m_sc[...] = jnp.full(m_sc.shape, -jnp.inf, jnp.float32)
        l_sc[...] = jnp.zeros(l_sc.shape, jnp.float32)
        acc_sc[...] = jnp.zeros(acc_sc.shape, jnp.float32)

    e = adst_ref[...] + asrc_ref[...]                  # [TM, 1] + [1, TS] -> [TM, TS]
    e = jnp.where(e > 0, e, 0.2 * e)                   # LeakyReLU(0.2)

    # Online (flash) softmax over incoming edges. The running max is taken over ALL
    # scores (valid stabilizer, guarantees exp(e - m) <= 1); non-edges are zeroed by a
    # single multiply with the 0/1 adjacency tile.
    adj_f = adj_ref[...].astype(jnp.float32)           # int8 -> f32
    m_prev = m_sc[...]
    m_new = jnp.maximum(m_prev, jnp.max(e, axis=-1, keepdims=True))
    p = jnp.exp(e - m_new) * adj_f                     # [TM, TS]
    rescale = jnp.exp(m_prev - m_new)                  # [TM, 1] (exp(-inf)=0 on 1st step)
    l_sc[...] = rescale * l_sc[...] + jnp.sum(p, axis=-1, keepdims=True)
    acc_sc[...] = rescale * acc_sc[...] + jnp.dot(p.astype(jnp.bfloat16), h_ref[...],
                                                  preferred_element_type=jnp.float32)
    m_sc[...] = m_new

    @pl.when(s == pl.num_programs(1) - 1)
    def _finalize():
        # Guard rows with no incoming edges (only padded rows here, thanks to self loops).
        l = jnp.maximum(l_sc[...], jnp.float32(1e-30))
        out = acc_sc[...] * pl.reciprocal(l, approx=True) + bias_ref[...]      # [TM, Cp]
        # TODO(synk): Dropout(p=0.3) is identity in eval mode; training-mode dropout would
        # need pltpu.prng_seed / pltpu.stateful_bernoulli here.
        # F.normalize(out, p=2, dim=1, eps=1e-12)  ->  out * rsqrt(max(sum(out^2), eps^2))
        ssq = jnp.sum(out * out, axis=-1, keepdims=True)
        o_ref[...] = out * lax.rsqrt(jnp.maximum(ssq, jnp.float32(1e-24)))


def graph_conv_forward(x, edge_index, params):
    """Wrapper: pads to lane-dense shapes, builds an int8 adjacency, runs the two passes."""
    n, c_in = x.shape
    c_out = params["wt"].shape[1]

    cin_p = _round_up(c_in, 128)
    cp = _round_up(c_out, 128)
    n_pad = _round_up(n, 128)
    tp = _pick_tile(n_pad, 512)     # pass-1 node tile
    tm = _pick_tile(n_pad, 256)     # destination-row tile (parallel axis)
    ts = _pick_tile(n_pad, 512)     # source tile (reduction axis)

    # Lane-dense, bf16 matmul operands (zero padding keeps the math exact).
    x_p = jnp.zeros((n_pad, cin_p), jnp.bfloat16).at[:n, :c_in].set(x.astype(jnp.bfloat16))
    wt_p = jnp.zeros((cin_p, cp), jnp.bfloat16).at[:c_in, :c_out].set(
        params["wt"].astype(jnp.bfloat16))
    att_src_p = jnp.zeros((1, cp), jnp.bfloat16).at[:, :c_out].set(
        params["att_src"].astype(jnp.bfloat16))
    att_dst_p = jnp.zeros((1, cp), jnp.bfloat16).at[:, :c_out].set(
        params["att_dst"].astype(jnp.bfloat16))
    bias_p = jnp.zeros((1, cp), jnp.float32).at[:, :c_out].set(params["bias"])

    # Dense int8 adjacency (adj[dst, src] = 1): 4x less DMA than f32. Duplicate edges
    # collapse to 1 (matches the unique edge list used here). Self loops only for real
    # nodes, matching GATConv's remove-then-add behaviour for a binary adjacency.
    # TODO(synk): fully sparse path (scalar-prefetched per-row edge offsets + gathered h_j)
    # not implemented; adjacency is dense int8 tiles.
    src = edge_index[0]
    dst = edge_index[1]
    adj = jnp.zeros((n_pad, n_pad), jnp.int8).at[dst, src].set(1)
    diag = jnp.arange(n)
    adj = adj.at[diag, diag].set(1)

    # ---- Pass 1: per-node projection + attention score terms (computed once). ----
    h_bf, a_src_row, a_dst_col = pl.pallas_call(
        gat_prep_kernel,
        out_shape=(
            jax.ShapeDtypeStruct((n_pad, cp), jnp.bfloat16),
            jax.ShapeDtypeStruct((1, n_pad), jnp.float32),
            jax.ShapeDtypeStruct((n_pad, 1), jnp.float32),
        ),
        grid_spec=pltpu.PrefetchScalarGridSpec(
            num_scalar_prefetch=0,
            grid=(n_pad // tp,),
            in_specs=[
                pl.BlockSpec((tp, cin_p), lambda i: (i, 0)),   # x rows
                pl.BlockSpec((cin_p, cp), lambda i: (0, 0)),   # W^T (resident)
                pl.BlockSpec((1, cp), lambda i: (0, 0)),       # att_src
                pl.BlockSpec((1, cp), lambda i: (0, 0)),       # att_dst
            ],
            out_specs=[
                pl.BlockSpec((tp, cp), lambda i: (i, 0)),      # h (bf16, lane-dense)
                pl.BlockSpec((1, tp), lambda i: (0, i)),       # a_src row (lane-dense)
                pl.BlockSpec((tp, 1), lambda i: (i, 0)),       # a_dst column
            ],
        ),
        compiler_params=pltpu.CompilerParams(
            dimension_semantics=("parallel",),
            vmem_limit_bytes=32 * 1024 * 1024,
        ),
    )(x_p, wt_p, att_src_p, att_dst_p)

    # ---- Pass 2: flash-softmax edge aggregation + bias + L2 normalize. ----
    grid = (n_pad // tm, n_pad // ts)
    out = pl.pallas_call(
        gat_flash_kernel,
        out_shape=jax.ShapeDtypeStruct((n_pad, cp), jnp.float32),
        grid_spec=pltpu.PrefetchScalarGridSpec(
            num_scalar_prefetch=0,
            grid=grid,
            in_specs=[
                pl.BlockSpec((tm, 1), lambda r, s: (r, 0)),    # a_dst column tile
                pl.BlockSpec((1, ts), lambda r, s: (0, s)),    # a_src row tile
                pl.BlockSpec((ts, cp), lambda r, s: (s, 0)),   # h source tile (bf16)
                pl.BlockSpec((1, cp), lambda r, s: (0, 0)),    # bias
                pl.BlockSpec((tm, ts), lambda r, s: (r, s)),   # adjacency tile (int8)
            ],
            out_specs=pl.BlockSpec((tm, cp), lambda r, s: (r, 0)),
            scratch_shapes=[
                pltpu.VMEM((tm, 1), jnp.float32),    # running max m
                pltpu.VMEM((tm, 1), jnp.float32),    # running denom l
                pltpu.VMEM((tm, cp), jnp.float32),   # output accumulator
            ],
        ),
        compiler_params=pltpu.CompilerParams(
            dimension_semantics=("parallel", "arbitrary"),
            vmem_limit_bytes=32 * 1024 * 1024,
        ),
    )(a_dst_col, a_src_row, h_bf, bias_p, adj)

    return out[:n, :c_out]


def graph_conv_reference(x, edge_index, params):
    """Plain-JAX f32 reference of GATConv(+self loops) -> eval Dropout -> F.normalize."""
    n = x.shape[0]
    h = x @ params["wt"]
    a_src = jnp.sum(h * params["att_src"], axis=-1)
    a_dst = jnp.sum(h * params["att_dst"], axis=-1)
    e = a_dst[:, None] + a_src[None, :]
    e = jnp.where(e > 0, e, 0.2 * e)
    adj = jnp.zeros((n, n), jnp.float32).at[edge_index[1], edge_index[0]].set(1.0)
    adj = adj.at[jnp.arange(n), jnp.arange(n)].set(1.0)
    e = jnp.where(adj > 0, e, -jnp.inf)
    alpha = jax.nn.softmax(e, axis=-1)
    out = alpha @ h + params["bias"]
    norm = jnp.maximum(jnp.linalg.norm(out, axis=-1, keepdims=True), 1e-12)
    return out / norm


def init_params(key, c_in, c_out):
    k1, k2, k3 = jax.random.split(key, 3)
    scale_w = (2.0 / (c_in + c_out)) ** 0.5
    scale_a = (2.0 / (1 + c_out)) ** 0.5
    return {
        # Stored pre-transposed as W^T : [Cin, Cout]
        "wt": jax.random.normal(k1, (c_in, c_out), jnp.float32) * scale_w,
        "att_src": jax.random.normal(k2, (1, c_out), jnp.float32) * scale_a,
        "att_dst": jax.random.normal(k3, (1, c_out), jnp.float32) * scale_a,
        "bias": jnp.zeros((1, c_out), jnp.float32),
    }


if __name__ == "__main__":
    N, C_IN, C_OUT = 16, 8, 32

    key = jax.random.PRNGKey(0)
    k_x, k_p = jax.random.split(key)

    x = jax.random.normal(k_x, (N, C_IN), jnp.float32)

    # Deterministic edge list: ring + skip-2 connections (unique, no self loops). [2, E]
    src = jnp.concatenate([jnp.arange(N), jnp.arange(N)])
    dst = jnp.concatenate([(jnp.arange(N) + 1) % N, (jnp.arange(N) + 2) % N])
    edge_index = jnp.stack([src, dst]).astype(jnp.int32)

    params = init_params(k_p, C_IN, C_OUT)

    out = graph_conv_forward(x, edge_index, params)
    jax.block_until_ready(out)

    assert out.shape == (N, C_OUT)

    ref = graph_conv_reference(x, edge_index, params)
    max_err = float(jnp.max(jnp.abs(out - ref)))
    assert max_err < 5e-2, f"kernel vs reference mismatch: max abs err {max_err}"

    print("KERNEL_OK")
</pallas_src>

<mosaic_0001>
module attributes {stable_mosaic.version = 11 : i64} {
  func.func @gat_prep_kernel(%arg0: i32, %arg1: memref<128x128xbf16, #tpu.memory_space<vmem>>, %arg2: memref<128x128xbf16, #tpu.memory_space<vmem>>, %arg3: memref<1x128xbf16, #tpu.memory_space<vmem>>, %arg4: memref<1x128xbf16, #tpu.memory_space<vmem>>, %arg5: memref<128x128xbf16, #tpu.memory_space<vmem>>, %arg6: memref<1x128xf32, #tpu.memory_space<vmem>>, %arg7: memref<128x1xf32, #tpu.memory_space<vmem>>) attributes {dimension_semantics = [#tpu.dimension_semantics<parallel>], iteration_bounds = array<i64: 1>, scalar_prefetch = 0 : i64, scratch_operands = 0 : i64, tpu.core_type = #tpu.core_type<tc>, window_params = [{transform_indices = @transform_0, window_bounds = array<i64: 128, 128>}, {pipeline_mode = #tpu.pipeline_mode<synchronous>, transform_indices = @transform_1, window_bounds = array<i64: 128, 128>}, {pipeline_mode = #tpu.pipeline_mode<synchronous>, transform_indices = @transform_2, window_bounds = array<i64: 1, 128>}, {pipeline_mode = #tpu.pipeline_mode<synchronous>, transform_indices = @transform_3, window_bounds = array<i64: 1, 128>}, {transform_indices = @transform_4, window_bounds = array<i64: 128, 128>}, {transform_indices = @transform_5, window_bounds = array<i64: 1, 128>}, {transform_indices = @transform_6, window_bounds = array<i64: 128, 1>}]} {
    %c0 = arith.constant 0 : index
    %c0_0 = arith.constant 0 : index
    %0 = vector.load %arg1[%c0, %c0_0] : memref<128x128xbf16, #tpu.memory_space<vmem>>, vector<128x128xbf16>
    %c0_1 = arith.constant 0 : index
    %c0_2 = arith.constant 0 : index
    %1 = vector.load %arg2[%c0_1, %c0_2] : memref<128x128xbf16, #tpu.memory_space<vmem>>, vector<128x128xbf16>
    %cst = arith.constant dense<0.000000e+00> : vector<128x128xf32>
    %2 = tpu.matmul %0, %1, %cst {dimension_numbers = #tpu.dot_dimension_numbers<[1], [0], [0], [1], [0, 0, 1, 1], [], []>} : vector<128x128xbf16>, vector<128x128xbf16>, vector<128x128xf32> -> vector<128x128xf32>
    %3 = arith.truncf %2 : vector<128x128xf32> to vector<128x128xbf16>
    %c0_3 = arith.constant 0 : index
    %c0_4 = arith.constant 0 : index
    %4 = vector.load %arg5[%c0_3, %c0_4] : memref<128x128xbf16, #tpu.memory_space<vmem>>, vector<128x128xbf16>
    tpu.vector_store %arg5[%c0_3, %c0_4], %3 {strides = array<i32>} : memref<128x128xbf16, #tpu.memory_space<vmem>>, vector<128x128xbf16>,
    %c0_5 = arith.constant 0 : index
    %c0_6 = arith.constant 0 : index
    %5 = vector.load %arg3[%c0_5, %c0_6] : memref<1x128xbf16, #tpu.memory_space<vmem>>, vector<1x128xbf16>
    %cst_7 = arith.constant dense<0.000000e+00> : vector<1x128xf32>
    %6 = tpu.matmul %5, %3, %cst_7 {dimension_numbers = #tpu.dot_dimension_numbers<[1], [1], [0], [0], [0, 0, 1, 0], [], []>} : vector<1x128xbf16>, vector<128x128xbf16>, vector<1x128xf32> -> vector<1x128xf32>
    %c0_8 = arith.constant 0 : index
    %c0_9 = arith.constant 0 : index
    %7 = vector.load %arg6[%c0_8, %c0_9] : memref<1x128xf32, #tpu.memory_space<vmem>>, vector<1x128xf32>
    tpu.vector_store %arg6[%c0_8, %c0_9], %6 {strides = array<i32>} : memref<1x128xf32, #tpu.memory_space<vmem>>, vector<1x128xf32>,
    %c0_10 = arith.constant 0 : index
    %c0_11 = arith.constant 0 : index
    %8 = vector.load %arg4[%c0_10, %c0_11] : memref<1x128xbf16, #tpu.memory_space<vmem>>, vector<1x128xbf16>
    %9 = arith.extf %8 : vector<1x128xbf16> to vector<1x128xf32>
    %10 = vector.broadcast %9 : vector<1x128xf32> to vector<128x128xf32>
    %11 = arith.mulf %2, %10 : vector<128x128xf32>
    %cst_12 = arith.constant dense<0.000000e+00> : vector<128xf32>
    %12 = vector.multi_reduction <add>, %11, %cst_12 [1] : vector<128x128xf32> to vector<128xf32>
    %13 = vector.shape_cast %12 : vector<128xf32> to vector<128x1xf32>
    %c0_13 = arith.constant 0 : index
    %c0_14 = arith.constant 0 : index
    %14 = vector.load %arg7[%c0_13, %c0_14] : memref<128x1xf32, #tpu.memory_space<vmem>>, vector<128x1xf32>
    tpu.vector_store %arg7[%c0_13, %c0_14], %13 {strides = array<i32>} : memref<128x1xf32, #tpu.memory_space<vmem>>, vector<128x1xf32>,
    return
  }
  func.func @transform_0(%arg0: i32) -> (i32, i32) {
    %c0_i32 = arith.constant 0 : i32
    %c0_i32_0 = arith.constant 0 : i32
    return %arg0, %c0_i32 : i32, i32
  }
  func.func @transform_1(%arg0: i32) -> (i32, i32) {
    %c0_i32 = arith.constant 0 : i32
    %c0_i32_0 = arith.constant 0 : i32
    %c0_i32_1 = arith.constant 0 : i32
    return %c0_i32, %c0_i32_0 : i32, i32
  }
  func.func @transform_2(%arg0: i32) -> (i32, i32) {
    %c0_i32 = arith.constant 0 : i32
    %c0_i32_0 = arith.constant 0 : i32
    %c0_i32_1 = arith.constant 0 : i32
    return %c0_i32, %c0_i32_0 : i32, i32
  }
  func.func @transform_3(%arg0: i32) -> (i32, i32) {
    %c0_i32 = arith.constant 0 : i32
    %c0_i32_0 = arith.constant 0 : i32
    %c0_i32_1 = arith.constant 0 : i32
    return %c0_i32, %c0_i32_0 : i32, i32
  }
  func.func @transform_4(%arg0: i32) -> (i32, i32) {
    %c0_i32 = arith.constant 0 : i32
    %c0_i32_0 = arith.constant 0 : i32
    return %arg0, %c0_i32 : i32, i32
  }
  func.func @transform_5(%arg0: i32) -> (i32, i32) {
    %c0_i32 = arith.constant 0 : i32
    %c0_i32_0 = arith.constant 0 : i32
    return %c0_i32, %arg0 : i32, i32
  }
  func.func @transform_6(%arg0: i32) -> (i32, i32) {
    %c0_i32 = arith.constant 0 : i32
    %c0_i32_0 = arith.constant 0 : i32
    return %arg0, %c0_i32 : i32, i32
  }
}

</mosaic_0001>

<bundles_post_ra>
// kernel: tpu_custom_call.1
= control target key start
LH: loop header
LB: loop body
LE: loop exit
PB: predicated region body
PF: predicated region fallthrough
CT: control target
= control target key end

     0   :  { %12 = vsyncpa [#allocation3], 0  ;;  %s994_s0 = inlined_call_operand.hbm [shape: bf16[128,128], index: 0, kind: input, shape index: {}]   ;;  %s995_s1 = inlined_call_operand.hbm [shape: bf16[128,128], index: 1, kind: input, shape index: {}]   ;;  %s996_s2 = inlined_call_operand.vmem [shape: bf16[1,128], index: 2, kind: input, shape index: {}]   ;;  %s997_s3 = inlined_call_operand.vmem [shape: bf16[1,128], index: 3, kind: input, shape index: {}]   ;;  %s998_s4 = inlined_call_operand.hbm [shape: bf16[128,128], index: 4, kind: output, shape index: {0}]   ;;  %s999_s5 = inlined_call_operand.hbm [shape: f32[1,128], index: 5, kind: output, shape index: {1}]   ;;  %s1000_s6 = inlined_call_operand.vmem [shape: f32[128,1], index: 6, kind: output, shape index: {2}]  }
   0x1   :  { %13 = vsyncpa [#allocation6], 0 }
   0x2   :  { %14 = vsyncpa [#allocation4], 0 }
   0x3   :  { %15 = vsyncpa [#allocation9], 0  ;;  %s797_s21 = smov [#allocation2]   ;;  %s701_s25 = scalar_lea.hbm %s994_s0, 1024 }
   0x4   :  { %s21_s22 = sshll.u32 %s797_s21, 4  ;;  %p702_p0 = scmp.ne.s32.totalorder %s994_s0, %s701_s25  ;;  %s22_s22 = int_to_ptr.vmem [resolvable:$true] %s21_s22 }
   0x5   :  { %p705_p1 = scmp.lt.u32.totalorder %s701_s25, %s994_s0 }
   0x7   :  { %p707_p2 = pnand %p705_p1, %p702_p0 }
   0x9   :  { %710 = shalt.err (!%p707_p2)
}
   0xa   :  { %s711_s30 = scalar_lea.vmem %s22_s22, 1024  ;;  %p716_p4 = scmp.lt.s32.totalorder %s22_s22, %s22_s22 }
   0xb   :  { %p712_p3 = scmp.ne.s32.totalorder %s22_s22, %s711_s30  ;;  %p717_p5 = scmp.lt.s32.totalorder %s711_s30, %s711_s30 }
   0xd   :  { %p718_p6 = por %p717_p5, %p716_p4 }
   0xf   :  { %p719_p7 = pnand %p718_p6, %p712_p3 }
  0x11   :  { %722 = shalt.err (!%p719_p7)
}
  0x12   :  { %s798_s7 = smov 64   ;;  %s799_s8 = smov 4  }
  0x13   :  { %27 = dma.hbm_to_vmem [thread:$0]  %s994_s0, 1024, %s22_s22, [#allocation3], %s798_s7, %s798_s7, %s799_s8  }
  0x14   :  { %s800_s11 = smov [#allocation5]   ;;  %s723_s15 = scalar_lea.hbm %s995_s1, 1024 }
  0x15   :  { %s33_s12 = sshll.u32 %s800_s11, 4  ;;  %p724_p8 = scmp.ne.s32.totalorder %s995_s1, %s723_s15  ;;  %s34_s12 = int_to_ptr.vmem [resolvable:$true] %s33_s12 }
  0x16   :  { %p727_p9 = scmp.lt.u32.totalorder %s723_s15, %s995_s1 }
  0x18   :  { %p729_p10 = pnand %p727_p9, %p724_p8 }
  0x1a   :  { %732 = shalt.err (!%p729_p10)
}
  0x1b   :  { %s733_s20 = scalar_lea.vmem %s34_s12, 1024  ;;  %p738_p12 = scmp.lt.s32.totalorder %s34_s12, %s34_s12 }
  0x1c   :  { %p734_p11 = scmp.ne.s32.totalorder %s34_s12, %s733_s20  ;;  %p739_p13 = scmp.lt.s32.totalorder %s733_s20, %s733_s20 }
  0x1e   :  { %p740_p0 = por %p739_p13, %p738_p12 }
  0x20   :  { %p741_p1 = pnand %p740_p0, %p734_p11 }
  0x22   :  { %744 = shalt.err (!%p741_p1)
}
  0x23   :  { %39 = dma.hbm_to_vmem [thread:$0]  %s995_s1, 1024, %s34_s12, [#allocation6], %s798_s7, %s798_s7, %s799_s8  }
  0x24   :  { %789 = dma.done.wait [#allocation3], 1024  }
  0x25   :  { %790 = vsyncadd [#allocation3], 4294966272 }
  0x26   :  { %791 = dma.done.wait [#allocation6], 1024  }
  0x27   :  { %792 = vsyncadd [#allocation6], 4294966272  ;;  %v685_v0 = vld [vmem:[#allocation5] sm:$0xff]   ;;  %v686_v1 = vld [vmem:[#allocation5 + $0x8] sm:$0xff]   ;;  %v801_v16 = vmov 0.0   ;;  %vm802_vm0 = vmmov 0   ;;  %v400_v17 = vlaneseq }
  0x28   :  { %625 = vmatprep.subr.bf16.mxu0 %v685_v0  ;;  %v687_v2 = vld [vmem:[#allocation5 + $0x10] sm:$0xff]   ;;  %v688_v3 = vld [vmem:[#allocation5 + $0x18] sm:$0xff]   ;;  %v693_v4 = vld [vmem:[#allocation2] sm:$0xff]   ;;  %657 = vmatprep.subr.bf16.mxu1 %v801_v16  ;;  %vm452_vm1 = vcmask 7168   ;;  %s803_s9 = smov [#allocation7]  }
  0x29   :  { %626 = vmatpush3.bf16.msra.mxu0 %v685_v0  ;;  %641 = vmatprep.mubr.bf16.mxu0 %v693_v4  ;;  %v689_v5 = vld [vmem:[#allocation5 + $0x20] sm:$0xff]   ;;  %v690_v6 = vld [vmem:[#allocation5 + $0x28] sm:$0xff]   ;;  %v691_v7 = vld [vmem:[#allocation5 + $0x30] sm:$0xff]   ;;  %v401_v18 = vshrl.u32 %v400_v17, 7  ;;  %s474_s10 = sshll.u32 %s803_s9, 4  ;;  %s475_s10 = int_to_ptr.vmem [resolvable:$true] %s474_s10 }
  0x2a   :  { %627 = vmatprep.subr.bf16.mxu0 %v686_v1  ;;  %v692_v8 = vld [vmem:[#allocation5 + $0x38] sm:$0xff]   ;;  %v694_v9 = vld [vmem:[#allocation2 + $0x8] sm:$0xff]   ;;  %v695_v10 = vld [vmem:[#allocation2 + $0x10] sm:$0xff]   ;;  %673 = vmatprep.mubr.msk.bf16.mxu1 %vm802_vm0, %v801_v16  ;;  %s745_s15 = scalar_lea.vmem %s475_s10, 1024  ;;  %p750_p3 = scmp.lt.s32.totalorder %s475_s10, %s475_s10 }
  0x2b   :  { %v696_v11 = vld [vmem:[#allocation2 + $0x18] sm:$0xff]   ;;  %v697_v12 = vld [vmem:[#allocation2 + $0x20] sm:$0xff]   ;;  %v698_v13 = vld [vmem:[#allocation2 + $0x28] sm:$0xff]   ;;  %v402_v21 = vsub.s32 0, %v401_v18  ;;  %p746_p2 = scmp.ne.s32.totalorder %s475_s10, %s745_s15  ;;  %p751_p4 = scmp.lt.s32.totalorder %s745_s15, %s745_s15 }
  0x2c   :  { %v699_v14 = vld [vmem:[#allocation2 + $0x30] sm:$0xff]   ;;  %v700_v15 = vld [vmem:[#allocation2 + $0x38] sm:$0xff]   ;;  %v398_v19 = vld [vmem:[%s997_s3] sm:$0x1] }
  0x2d   :  { %628 = vmatpush3.bf16.msra.mxu0 %v686_v1  ;;  %v399_v20 = vunpack.c.l.bf16 %v398_v19  ;;  %v356_v63 = vld [vmem:[%s996_s2] sm:$0x1]  ;;  %p752_p5 = por %p751_p4, %p750_p3 }
  0x2e   :  { %629 = vmatprep.subr.bf16.mxu0 %v687_v2 }
  0x2f   :  { %v875_v22 = vrot.slane %v399_v20, %v402_v21  ;;  %p753_p6 = pnand %p752_p5, %p746_p2 }
  0x31   :  { %630 = vmatpush3.bf16.msra.mxu0 %v687_v2 }
  0x32   :  { %631 = vmatprep.subr.bf16.mxu0 %v688_v3 }
  0x35   :  { %632 = vmatpush3.bf16.msra.mxu0 %v688_v3 }
  0x36   :  { %633 = vmatprep.subr.bf16.mxu0 %v689_v5 }
  0x39   :  { %634 = vmatpush3.bf16.msra.mxu0 %v689_v5 }
  0x3a   :  { %635 = vmatprep.subr.bf16.mxu0 %v690_v6 }
  0x3d   :  { %636 = vmatpush3.bf16.msra.mxu0 %v690_v6 }
  0x3e   :  { %637 = vmatprep.subr.bf16.mxu0 %v691_v7 }
  0x41   :  { %638 = vmatpush3.bf16.msra.mxu0 %v691_v7 }
  0x42   :  { %639 = vmatprep.subr.bf16.mxu0 %v692_v8 }
  0x45   :  { %640 = vmatpush3.bf16.msra.mxu0 %v692_v8 }
  0x48   :  { %642 = vmatmul.mubr.bf16.vlgmr.msra.gmra.mrb[0].mxu0 %v694_v9 }
  0x49   :  { %645 = vmatprep.mubr.bf16.mxu0 %v695_v10 }
  0x50   :  { %646 = vmatmul.mubr.bf16.gmra.mrb[4].mxu0 %v696_v11 }
  0x51   :  { %649 = vmatprep.mubr.bf16.mxu0 %v697_v12 }
  0x58   :  { %650 = vmatmul.mubr.bf16.gmra.mrb[8].mxu0 %v698_v13 }
  0x59   :  { %653 = vmatprep.mubr.bf16.mxu0 %v699_v14 }
  0x60   :  { %654 = vmatmul.mubr.bf16.gmra.mrb[12].mxu0 %v700_v15 }
 0x11b   :  { %v643_v23 = vpop.f32.mrb[0].mxu0 }
 0x11c   :  { %v213_v24 = vpop.f32.mrb[1].mxu0  ;;  %v406_v25 = vmul.f32 %v643_v23, %v875_v22 }
 0x11d   :  { %v644_v26 = vpop.f32.mrb[2].mxu0  ;;  %v404_v27 = vmul.f32 %v875_v22, %v213_v24 }
 0x11e   :  { %v277_v28 = vpack.c.bf16 %v644_v26, %v643_v23  ;;  %424 = vadd.xlane.f32.xlu1 %v406_v25  ;;  %v216_v29 = vpop.f32.mrb[3].mxu0  ;;  %v407_v31 = vmul.f32 %v644_v26, %v875_v22 }
 0x11f   :  { %420 = vadd.xlane.f32.xlu0 %v404_v27  ;;  %v276_v30 = vpack.c.bf16 %v216_v29, %v213_v24  ;;  %v405_v32 = vmul.f32 %v875_v22, %v216_v29 }
 0x120   :  { %593 = vst [vmem:[#allocation7 + $0x8] sm:$0xff] %v277_v28  }
 0x121   :  { %557 = vst [vmem:[#allocation7] sm:$0xff] %v276_v30   ;;  %658 = vmatpush3.bf16.xpose.msra.mxu1 %v276_v30 }
 0x122   :  { %426 = vadd.xlane.f32.xlu1 %v407_v31  ;;  %659 = vmatprep.subr.bf16.mxu1 %v801_v16 }
 0x123   :  { %422 = vadd.xlane.f32.xlu0 %v405_v32  ;;  %v647_v33 = vpop.f32.mrb[4].mxu0 }
 0x124   :  { %v229_v34 = vpop.f32.mrb[5].mxu0  ;;  %v410_v35 = vmul.f32 %v647_v33, %v875_v22 }
 0x125   :  { %v648_v36 = vpop.f32.mrb[6].mxu0  ;;  %v408_v41 = vmul.f32 %v875_v22, %v229_v34 }
 0x126   :  { %v279_v37 = vpack.c.bf16 %v648_v36, %v647_v33  ;;  %v411_v38 = vmul.f32 %v648_v36, %v875_v22  ;;  %v232_v39 = vpop.f32.mrb[7].mxu0 }
 0x127   :  { %432 = vadd.xlane.f32.xlu0 %v410_v35  ;;  %v278_v40 = vpack.c.bf16 %v232_v39, %v229_v34  ;;  %v409_v42 = vmul.f32 %v875_v22, %v232_v39 }
 0x128   :  { %595 = vst [vmem:[#allocation7 + $0x18] sm:$0xff] %v279_v37   ;;  %434 = vadd.xlane.f32.xlu1 %v411_v38 }
 0x129   :  { %660 = vmatpush3.bf16.xpose.msra.mxu1 %v277_v28  ;;  %594 = vst [vmem:[#allocation7 + $0x10] sm:$0xff] %v278_v40  }
 0x12a   :  { %661 = vmatprep.subr.bf16.mxu1 %v801_v16 }
 0x12b   :  { %428 = vadd.xlane.f32.xlu0 %v408_v41  ;;  %v651_v43 = vpop.f32.mrb[8].mxu0 }
 0x12c   :  { %430 = vadd.xlane.f32.xlu1 %v409_v42  ;;  %v245_v44 = vpop.f32.mrb[9].mxu0  ;;  %v414_v45 = vmul.f32 %v651_v43, %v875_v22 }
 0x12d   :  { %v652_v46 = vpop.f32.mrb[10].mxu0  ;;  %v412_v51 = vmul.f32 %v875_v22, %v245_v44 }
 0x12e   :  { %v281_v47 = vpack.c.bf16 %v652_v46, %v651_v43  ;;  %v415_v48 = vmul.f32 %v652_v46, %v875_v22  ;;  %v248_v49 = vpop.f32.mrb[11].mxu0 }
 0x12f   :  { %440 = vadd.xlane.f32.xlu0 %v414_v45  ;;  %v280_v50 = vpack.c.bf16 %v248_v49, %v245_v44  ;;  %v413_v52 = vmul.f32 %v875_v22, %v248_v49 }
 0x130   :  { %597 = vst [vmem:[#allocation7 + $0x28] sm:$0xff] %v281_v47   ;;  %442 = vadd.xlane.f32.xlu1 %v415_v48 }
 0x131   :  { %662 = vmatpush3.bf16.xpose.msra.mxu1 %v278_v40  ;;  %596 = vst [vmem:[#allocation7 + $0x20] sm:$0xff] %v280_v50  }
 0x132   :  { %663 = vmatprep.subr.bf16.mxu1 %v801_v16 }
 0x133   :  { %436 = vadd.xlane.f32.xlu0 %v412_v51  ;;  %v655_v53 = vpop.f32.mrb[12].mxu0 }
 0x134   :  { %438 = vadd.xlane.f32.xlu1 %v413_v52  ;;  %v261_v54 = vpop.f32.mrb[13].mxu0  ;;  %v418_v61 = vmul.f32 %v655_v53, %v875_v22 }
 0x135   :  { %v656_v55 = vpop.f32.mrb[14].mxu0  ;;  %v416_v56 = vmul.f32 %v875_v22, %v261_v54 }
 0x136   :  { %v283_v57 = vpack.c.bf16 %v656_v55, %v655_v53  ;;  %v264_v58 = vpop.f32.mrb[15].mxu0  ;;  %v419_v62 = vmul.f32 %v656_v55, %v875_v22 }
 0x137   :  { %v282_v59 = vpack.c.bf16 %v264_v58, %v261_v54  ;;  %v417_v60 = vmul.f32 %v875_v22, %v264_v58  ;;  %444 = vadd.xlane.f32.xlu0 %v416_v56 }
 0x138   :  { %599 = vst [vmem:[#allocation7 + $0x38] sm:$0xff] %v283_v57  }
 0x139   :  { %664 = vmatpush3.bf16.xpose.msra.mxu1 %v279_v37  ;;  %598 = vst [vmem:[#allocation7 + $0x30] sm:$0xff] %v282_v59   ;;  %446 = vadd.xlane.f32.xlu1 %v417_v60 }
 0x13a   :  { %665 = vmatprep.subr.bf16.mxu1 %v801_v16 }
 0x13b   :  { %448 = vadd.xlane.f32.xlu0 %v418_v61 }
 0x13d   :  { %450 = vadd.xlane.f32.xlu1 %v419_v62 }
 0x141   :  { %666 = vmatpush3.bf16.xpose.msra.mxu1 %v280_v50 }
 0x142   :  { %667 = vmatprep.subr.bf16.mxu1 %v801_v16 }
 0x149   :  { %668 = vmatpush3.bf16.xpose.msra.mxu1 %v281_v47 }
 0x14a   :  { %669 = vmatprep.subr.bf16.mxu1 %v801_v16 }
 0x151   :  { %670 = vmatpush3.bf16.xpose.msra.mxu1 %v282_v59 }
 0x152   :  { %671 = vmatprep.subr.bf16.mxu1 %v801_v16 }
 0x159   :  { %672 = vmatpush3.bf16.xpose.msra.mxu1 %v283_v57 }
 0x160   :  { %674 = vmatmul.mubr.bf16.vlgmr.msra.gmra.mrb[0].mxu1 %v356_v63 }
 0x1ab   :  { %v425_v0 = vpop.xlane.xlu1 %424 }
 0x1ac   :  { %455 = vst.msk [vmem:[%s1000_s6 + $0x10] sm:$0xff] %vm452_vm1, %v425_v0  ;;  %v421_v1 = vpop.xlane.xlu0 %420 }
 0x1ad   :  { %453 = vst.msk [vmem:[%s1000_s6] sm:$0xff] %vm452_vm1, %v421_v1 }
 0x1af   :  { %v427_v2 = vpop.xlane.xlu1 %426 }
 0x1b0   :  { %456 = vst.msk [vmem:[%s1000_s6 + $0x18] sm:$0xff] %vm452_vm1, %v427_v2  ;;  %v423_v3 = vpop.xlane.xlu0 %422 }
 0x1b1   :  { %454 = vst.msk [vmem:[%s1000_s6 + $0x8] sm:$0xff] %vm452_vm1, %v423_v3 }
 0x1b4   :  { %v433_v4 = vpop.xlane.xlu0 %432 }
 0x1b5   :  { %459 = vst.msk [vmem:[%s1000_s6 + $0x30] sm:$0xff] %vm452_vm1, %v433_v4  ;;  %v435_v5 = vpop.xlane.xlu1 %434 }
 0x1b6   :  { %460 = vst.msk [vmem:[%s1000_s6 + $0x38] sm:$0xff] %vm452_vm1, %v435_v5 }
 0x1b7   :  { %756 = shalt.err (!%p753_p6)
}
 0x1b8   :  { %s757_s18 = scalar_lea.hbm %s998_s4, 1024 }
 0x1b9   :  { %p758_p7 = scmp.ne.s32.totalorder %s998_s4, %s757_s18  ;;  %p761_p8 = scmp.lt.u32.totalorder %s757_s18, %s998_s4 }
 0x1bb   :  { %p763_p9 = pnand %p761_p8, %p758_p7 }
 0x1bd   :  { %766 = shalt.err (!%p763_p9)
}
 0x1be   :  { %480 = dma.vmem_to_hbm [thread:$0]  %s475_s10, 1024, %s998_s4, [#allocation4], %s798_s7, %s798_s7, %s799_s8   ;;  %v429_v6 = vpop.xlane.xlu0 %428  ;;  %v431_v7 = vpop.xlane.xlu1 %430 }
 0x1bf   :  { %457 = vst.msk [vmem:[%s1000_s6 + $0x20] sm:$0xff] %vm452_vm1, %v429_v6  ;;  %458 = vst.msk [vmem:[%s1000_s6 + $0x28] sm:$0xff] %vm452_vm1, %v431_v7  ;;  %s804_s16 = smov [#allocation8]  }
 0x1c0   :  { %s487_s17 = sshll.u32 %s804_s16, 4  ;;  %s488_s17 = int_to_ptr.vmem [resolvable:$true] %s487_s17 }
 0x1c1   :  { %s767_s18 = scalar_lea.vmem %s488_s17, 16  ;;  %s771_s19 = scalar_lea.vmem %s488_s17, 32 }
 0x1c2   :  { %v441_v8 = vpop.xlane.xlu0 %440  ;;  %v443_v9 = vpop.xlane.xlu1 %442  ;;  %p768_p10 = scmp.ne.s32.totalorder %s488_s17, %s767_s18  ;;  %p772_p11 = scmp.lt.s32.totalorder %s488_s17, %s488_s17 }
 0x1c3   :  { %463 = vst.msk [vmem:[%s1000_s6 + $0x50] sm:$0xff] %vm452_vm1, %v441_v8  ;;  %464 = vst.msk [vmem:[%s1000_s6 + $0x58] sm:$0xff] %vm452_vm1, %v443_v9  ;;  %p773_p12 = scmp.lt.s32.totalorder %s771_s19, %s767_s18 }
 0x1c5   :  { %p774_p13 = por %p773_p12, %p772_p11 }
 0x1c6   :  { %v437_v10 = vpop.xlane.xlu0 %436  ;;  %v439_v11 = vpop.xlane.xlu1 %438 }
 0x1c7   :  { %461 = vst.msk [vmem:[%s1000_s6 + $0x40] sm:$0xff] %vm452_vm1, %v437_v10  ;;  %462 = vst.msk [vmem:[%s1000_s6 + $0x48] sm:$0xff] %vm452_vm1, %v439_v11  ;;  %p775_p0 = pnand %p774_p13, %p768_p10 }
 0x1ca   :  { %v445_v12 = vpop.xlane.xlu0 %444  ;;  %v447_v13 = vpop.xlane.xlu1 %446 }
 0x1cb   :  { %465 = vst.msk [vmem:[%s1000_s6 + $0x60] sm:$0xff] %vm452_vm1, %v445_v12  ;;  %466 = vst.msk [vmem:[%s1000_s6 + $0x68] sm:$0xff] %vm452_vm1, %v447_v13 }
 0x1ce   :  { %v449_v14 = vpop.xlane.xlu0 %448  ;;  %v451_v15 = vpop.xlane.xlu1 %450 }
 0x1cf   :  { %467 = vst.msk [vmem:[%s1000_s6 + $0x70] sm:$0xff] %vm452_vm1, %v449_v14  ;;  %468 = vst.msk [vmem:[%s1000_s6 + $0x78] sm:$0xff] %vm452_vm1, %v451_v15 }
 0x233   :  { %v391_v16 = vpop.f32.mrb[0].mxu1 }
 0x234   :  { %397 = vst [vmem:[#allocation8] sm:$0x1] %v391_v16  ;;  %v675_v17 = vpop.f32.mrb[1].mxu1 }
 0x235   :  { %v394_v18 = vpop.f32.mrb[2].mxu1 }
 0x236   :  { %778 = shalt.err (!%p775_p0)
}
 0x237   :  { %s779_s21 = scalar_lea.hbm %s999_s5, 16 }
 0x238   :  { %p780_p1 = scmp.ne.s32.totalorder %s999_s5, %s779_s21  ;;  %p783_p2 = scmp.lt.u32.totalorder %s779_s21, %s999_s5 }
 0x23a   :  { %p785_p3 = pnand %p783_p2, %p780_p1 }
 0x23c   :  { %788 = shalt.err (!%p785_p3)
}
 0x23d   :  { %490 = dma.vmem_to_hbm [thread:$0]  %s488_s17, 16, %s999_s5, [#allocation9]   ;;  %v676_v19 = vpop.f32.mrb[3].mxu1 }
 0x23e   :  { %793 = dma.done.wait [#allocation4], 1024  }
 0x23f   :  { %794 = vsyncadd [#allocation4], 4294966272 }
 0x240   :  { %795 = dma.done.wait [#allocation9], 16  }
 0x241   :  { %796 = vsyncadd [#allocation9], 4294967280 }
 0x242   :  { %501 = vsyncpa [#allocation3], 1 }
 0x243   :  { %502 = vsyncpa [#allocation6], 1 }
 0x244   :  { %503 = vsyncpa [#allocation4], 1 }
 0x245   :  { %504 = vsyncpa [#allocation9], 1 }

</bundles_post_ra>
